<compile_context>
chip_gen: v7x
topology: tpu7x:2x2x1
jax: 0.10.0
libtpu: 0.0.40
codegen_flags: <defaults>
</compile_context>

<pallas_src>
import functools

import jax
import jax.numpy as jnp
from jax.experimental import pallas as pl
from jax.experimental.pallas import tpu as pltpu

M_UE = 8
ACT_DIM = M_UE + M_UE          # 16, as in the PyTorch file
STATE_DIM = 32                 # small synthetic state dimension
IN_DIM = STATE_DIM + ACT_DIM   # 48
HIDDEN = 128


def _round_up(x, m):
    return (x + m - 1) // m * m


def _pick_tile(batch, block_b):
    """Batch-tile size: multiple of 8 (sublane) or the full batch."""
    block_b = int(block_b)
    if batch > block_b:
        return _round_up(block_b, 8)
    if batch > 256:
        # The whole batch fits in one tile; split in two so the "parallel"
        # grid axis can be sharded across v7x's two TensorCores.
        return _round_up((batch + 1) // 2, 8)
    return batch  # single full-batch tile (block dim == array dim is legal)


def _critic_kernel(state_ref, act_ref, w1_ref, bw_ref, out_ref):
    # Batch-major layout:
    #   state_ref: (TB, STATE_DIM)   act_ref: (TB, ACT_DIM)
    #   w1_ref:    (IN_DIM, HIDDEN)  -- VMEM-resident, sliced in-kernel
    #   bw_ref:    (3, HIDDEN)       -- row 0 = b1, row 1 = w2, row 2 = b2
    #   out_ref:   (TB, 1)
    # First Linear: concat fused as two matmuls on static slices of W1,
    # f32 accumulation on the MXU.
    h = (
        jnp.dot(state_ref[...], w1_ref[:STATE_DIM, :],
                preferred_element_type=jnp.float32)
        + jnp.dot(act_ref[...], w1_ref[STATE_DIM:, :],
                  preferred_element_type=jnp.float32)
        + bw_ref[0:1, :]                       # b1 broadcasts over rows
    )
    h = jnp.maximum(h, 0.0)                    # (TB, HIDDEN) f32 on the VPU

    # Second Linear is a 128 -> 1 projection: VPU multiply + lane reduction
    # (XLU) rather than an N=1 MXU matmul; add the scalar b2 in-kernel.
    y = jnp.sum(h * bw_ref[1:2, :], axis=-1, keepdims=True) + bw_ref[2:3, 0:1]
    out_ref[...] = y.astype(out_ref.dtype)


@functools.partial(jax.jit, static_argnames=("block_b",))
def critic_forward(state, act, params, *, block_b=8192):
    """state: (B, STATE_DIM) f32, act: (B, ACT_DIM) f32 -> (B, 1) f32."""
    w1, b1, w2, b2 = params["w1"], params["b1"], params["w2"], params["b2"]
    B = state.shape[0]

    tb = _pick_tile(B, block_b)
    grid = (pl.cdiv(B, tb),)

    # Tiny (3, HIDDEN) f32 epilogue operand; negligible wrapper cost.
    bw = jnp.stack([
        b1.astype(jnp.float32),
        w2.reshape(HIDDEN).astype(jnp.float32),
        jnp.broadcast_to(b2.astype(jnp.float32), (HIDDEN,)),
    ])

    cost = pl.CostEstimate(
        flops=2 * B * IN_DIM * HIDDEN + 2 * B * HIDDEN,
        transcendentals=0,
        bytes_accessed=B * (IN_DIM + 1) * 4 + (IN_DIM * HIDDEN + 3 * HIDDEN) * 4,
    )

    return pl.pallas_call(
        _critic_kernel,
        out_shape=jax.ShapeDtypeStruct((B, 1), jnp.float32),
        grid=grid,
        in_specs=[
            # Blocked batch-major activations: one (tb, feat) slab per step.
            pl.BlockSpec((tb, STATE_DIM), lambda i: (i, 0)),
            pl.BlockSpec((tb, ACT_DIM), lambda i: (i, 0)),
            # VMEM-resident weights / epilogue (constant block index -> 1 DMA).
            pl.BlockSpec((IN_DIM, HIDDEN), lambda i: (0, 0)),
            pl.BlockSpec((3, HIDDEN), lambda i: (0, 0)),
        ],
        out_specs=pl.BlockSpec((tb, 1), lambda i: (i, 0)),
        compiler_params=pltpu.CompilerParams(
            dimension_semantics=("parallel",)),
        cost_estimate=cost,
    )(state.astype(jnp.float32), act.astype(jnp.float32),
      w1.astype(jnp.float32), bw)


def init_params(key, state_dim, act_dim, hidden):
    """Deterministic PyTorch-style (uniform +-1/sqrt(fan_in)) init."""
    k1, k2, k3, k4 = jax.random.split(key, 4)
    in1 = state_dim + act_dim
    bnd1 = 1.0 / jnp.sqrt(jnp.float32(in1))
    bnd2 = 1.0 / jnp.sqrt(jnp.float32(hidden))
    return {
        "w1": jax.random.uniform(k1, (in1, hidden), jnp.float32, -bnd1, bnd1),
        "b1": jax.random.uniform(k2, (hidden,), jnp.float32, -bnd1, bnd1),
        "w2": jax.random.uniform(k3, (hidden, 1), jnp.float32, -bnd2, bnd2),
        "b2": jax.random.uniform(k4, (1,), jnp.float32, -bnd2, bnd2),
    }


def critic_reference(state, act, params):
    x = jnp.concatenate([state, act], axis=-1)
    h = jnp.maximum(x @ params["w1"] + params["b1"], 0.0)
    return h @ params["w2"] + params["b2"]


if __name__ == "__main__":
    key = jax.random.PRNGKey(0)
    kp, ks, ka, ks2, ka2 = jax.random.split(key, 5)

    params = init_params(kp, STATE_DIM, ACT_DIM, HIDDEN)

    # Small batch: single full-batch tile, grid of 1.
    B = 8
    state = jax.random.normal(ks, (B, STATE_DIM), jnp.float32)
    act = jax.random.normal(ka, (B, ACT_DIM), jnp.float32)
    ref = critic_reference(state, act, params)
    out = jax.block_until_ready(critic_forward(state, act, params))
    assert out.shape == (B, 1)
    assert jnp.allclose(out, ref, atol=1e-3, rtol=1e-3)

    # Larger batch: exercises the 2-step grid split and the masked partial
    # boundary block (300 = 152 + 148 rows).
    B2 = 300
    state2 = jax.random.normal(ks2, (B2, STATE_DIM), jnp.float32)
    act2 = jax.random.normal(ka2, (B2, ACT_DIM), jnp.float32)
    ref2 = critic_reference(state2, act2, params)
    out2 = jax.block_until_ready(critic_forward(state2, act2, params))
    assert out2.shape == (B2, 1)
    assert jnp.allclose(out2, ref2, atol=1e-3, rtol=1e-3)

    print("KERNEL_OK")
</pallas_src>

<mosaic_0001>
module attributes {stable_mosaic.version = 11 : i64} {
  func.func @_critic_kernel(%arg0: i32, %arg1: memref<8x32xf32, #tpu.memory_space<vmem>>, %arg2: memref<8x16xf32, #tpu.memory_space<vmem>>, %arg3: memref<48x128xf32, #tpu.memory_space<vmem>>, %arg4: memref<3x128xf32, #tpu.memory_space<vmem>>, %arg5: memref<8x1xf32, #tpu.memory_space<vmem>>) attributes {dimension_semantics = [#tpu.dimension_semantics<parallel>], iteration_bounds = array<i64: 1>, scalar_prefetch = 0 : i64, scratch_operands = 0 : i64, tpu.core_type = #tpu.core_type<tc>, window_params = [{transform_indices = @transform_0, window_bounds = array<i64: 8, 32>}, {transform_indices = @transform_1, window_bounds = array<i64: 8, 16>}, {pipeline_mode = #tpu.pipeline_mode<synchronous>, transform_indices = @transform_2, window_bounds = array<i64: 48, 128>}, {pipeline_mode = #tpu.pipeline_mode<synchronous>, transform_indices = @transform_3, window_bounds = array<i64: 3, 128>}, {transform_indices = @transform_4, window_bounds = array<i64: 8, 1>}]} {
    %c0 = arith.constant 0 : index
    %c0_0 = arith.constant 0 : index
    %0 = vector.load %arg1[%c0, %c0_0] : memref<8x32xf32, #tpu.memory_space<vmem>>, vector<8x32xf32>
    %c0_1 = arith.constant 0 : index
    %c0_2 = arith.constant 0 : index
    %1 = vector.load %arg3[%c0_1, %c0_2] : memref<48x128xf32, #tpu.memory_space<vmem>>, vector<32x128xf32>
    %cst = arith.constant dense<0.000000e+00> : vector<8x128xf32>
    %2 = tpu.matmul %0, %1, %cst {dimension_numbers = #tpu.dot_dimension_numbers<[1], [0], [0], [1], [0, 0, 1, 1], [], []>} : vector<8x32xf32>, vector<32x128xf32>, vector<8x128xf32> -> vector<8x128xf32>
    %c0_3 = arith.constant 0 : index
    %c0_4 = arith.constant 0 : index
    %3 = vector.load %arg2[%c0_3, %c0_4] : memref<8x16xf32, #tpu.memory_space<vmem>>, vector<8x16xf32>
    %c32 = arith.constant 32 : index
    %c0_5 = arith.constant 0 : index
    %4 = vector.load %arg3[%c32, %c0_5] : memref<48x128xf32, #tpu.memory_space<vmem>>, vector<16x128xf32>
    %cst_6 = arith.constant dense<0.000000e+00> : vector<8x128xf32>
    %5 = tpu.matmul %3, %4, %cst_6 {dimension_numbers = #tpu.dot_dimension_numbers<[1], [0], [0], [1], [0, 0, 1, 1], [], []>} : vector<8x16xf32>, vector<16x128xf32>, vector<8x128xf32> -> vector<8x128xf32>
    %6 = arith.addf %2, %5 : vector<8x128xf32>
    %c0_7 = arith.constant 0 : index
    %c0_8 = arith.constant 0 : index
    %7 = vector.load %arg4[%c0_7, %c0_8] : memref<3x128xf32, #tpu.memory_space<vmem>>, vector<1x128xf32>
    %8 = vector.broadcast %7 : vector<1x128xf32> to vector<8x128xf32>
    %9 = arith.addf %6, %8 : vector<8x128xf32>
    %cst_9 = arith.constant 0.000000e+00 : f32
    %10 = vector.broadcast %cst_9 : f32 to vector<8x128xf32>
    %11 = arith.maximumf %9, %10 : vector<8x128xf32>
    %c1 = arith.constant 1 : index
    %c0_10 = arith.constant 0 : index
    %12 = vector.load %arg4[%c1, %c0_10] : memref<3x128xf32, #tpu.memory_space<vmem>>, vector<1x128xf32>
    %13 = vector.broadcast %12 : vector<1x128xf32> to vector<8x128xf32>
    %14 = arith.mulf %11, %13 : vector<8x128xf32>
    %cst_11 = arith.constant dense<0.000000e+00> : vector<8xf32>
    %15 = vector.multi_reduction <add>, %14, %cst_11 [1] : vector<8x128xf32> to vector<8xf32>
    %16 = vector.shape_cast %15 : vector<8xf32> to vector<8x1xf32>
    %c2 = arith.constant 2 : index
    %c0_12 = arith.constant 0 : index
    %17 = vector.load %arg4[%c2, %c0_12] : memref<3x128xf32, #tpu.memory_space<vmem>>, vector<1x1xf32>
    %18 = vector.broadcast %17 : vector<1x1xf32> to vector<8x1xf32>
    %19 = arith.addf %16, %18 : vector<8x1xf32>
    %c0_13 = arith.constant 0 : index
    %c0_14 = arith.constant 0 : index
    %20 = vector.load %arg5[%c0_13, %c0_14] : memref<8x1xf32, #tpu.memory_space<vmem>>, vector<8x1xf32>
    tpu.vector_store %arg5[%c0_13, %c0_14], %19 {strides = array<i32>} : memref<8x1xf32, #tpu.memory_space<vmem>>, vector<8x1xf32>,
    return
  }
  func.func @transform_0(%arg0: i32) -> (i32, i32) {
    %c0_i32 = arith.constant 0 : i32
    %c0_i32_0 = arith.constant 0 : i32
    return %arg0, %c0_i32 : i32, i32
  }
  func.func @transform_1(%arg0: i32) -> (i32, i32) {
    %c0_i32 = arith.constant 0 : i32
    %c0_i32_0 = arith.constant 0 : i32
    return %arg0, %c0_i32 : i32, i32
  }
  func.func @transform_2(%arg0: i32) -> (i32, i32) {
    %c0_i32 = arith.constant 0 : i32
    %c0_i32_0 = arith.constant 0 : i32
    %c0_i32_1 = arith.constant 0 : i32
    return %c0_i32, %c0_i32_0 : i32, i32
  }
  func.func @transform_3(%arg0: i32) -> (i32, i32) {
    %c0_i32 = arith.constant 0 : i32
    %c0_i32_0 = arith.constant 0 : i32
    %c0_i32_1 = arith.constant 0 : i32
    return %c0_i32, %c0_i32_0 : i32, i32
  }
  func.func @transform_4(%arg0: i32) -> (i32, i32) {
    %c0_i32 = arith.constant 0 : i32
    %c0_i32_0 = arith.constant 0 : i32
    return %arg0, %c0_i32 : i32, i32
  }
}

</mosaic_0001>

<bundles_post_ra>
// kernel: critic_forward.1
= control target key start
LH: loop header
LB: loop body
LE: loop exit
PB: predicated region body
PF: predicated region fallthrough
CT: control target
= control target key end

     0   :  { %9 = vsyncpa [#allocation3], 0  ;;  %s285_s15 = smov [#allocation2]   ;;  %s346_s0 = inlined_call_operand.vmem [shape: f32[8,32], index: 0, kind: input, shape index: {}]   ;;  %s347_s1 = inlined_call_operand.vmem [shape: f32[8,16], index: 1, kind: input, shape index: {}]   ;;  %s348_s2 = inlined_call_operand.hbm [shape: f32[48,128], index: 2, kind: input, shape index: {}]   ;;  %s349_s3 = inlined_call_operand.vmem [shape: f32[3,128], index: 3, kind: input, shape index: {}]   ;;  %s350_s4 = inlined_call_operand.vmem [shape: f32[8,1], index: 4, kind: output, shape index: {}]  }
   0x1   :  { %s19_s16 = sshll.u32 %s285_s15, 4  ;;  %s261_s19 = scalar_lea.hbm %s348_s2, 768  ;;  %s20_s16 = int_to_ptr.vmem [resolvable:$true] %s19_s16 }
   0x2   :  { %p262_p0 = scmp.ne.s32.totalorder %s348_s2, %s261_s19  ;;  %p265_p1 = scmp.lt.u32.totalorder %s261_s19, %s348_s2 }
   0x4   :  { %p267_p2 = pnand %p265_p1, %p262_p0 }
   0x6   :  { %270 = shalt.err (!%p267_p2)
}
   0x7   :  { %s271_s24 = scalar_lea.vmem %s20_s16, 768  ;;  %p276_p4 = scmp.lt.s32.totalorder %s20_s16, %s20_s16 }
   0x8   :  { %p272_p3 = scmp.ne.s32.totalorder %s20_s16, %s271_s24  ;;  %p277_p5 = scmp.lt.s32.totalorder %s271_s24, %s271_s24 }
   0xa   :  { %p278_p6 = por %p277_p5, %p276_p4 }
   0xc   :  { %p279_p7 = pnand %p278_p6, %p272_p3 }
   0xe   :  { %282 = shalt.err (!%p279_p7)
}
   0xf   :  { %s286_s25 = smov 128   ;;  %s287_s26 = smov 8  }
  0x10   :  { %25 = dma.hbm_to_vmem [thread:$0]  %s348_s2, 768, %s20_s16, [#allocation3], %s286_s25, %s286_s25, %s287_s26  }
  0x11   :  { %283 = dma.done.wait [#allocation3], 768  }
  0x12   :  { %284 = vsyncadd [#allocation3], 4294966528  ;;  %v288_v0 = vmov 0.0|0.0   ;;  %vm289_vm0 = vmmov 0   ;;  %v290_v1 = vmov 0.0   ;;  %v32_v2 = vld [vmem:[#allocation2] sm:$0xff] }
  0x13   :  { %249 = vmatprep.subr.bf16.mxu1 %v288_v0  ;;  %246 = vmatprep.subr.bf16.mxu0 %v288_v0  ;;  %v33_v3 = vld [vmem:[#allocation2 + $0x8] sm:$0xff]  ;;  %v37_v4 = vld [vmem:[#allocation2 + $0x20] sm:$0xff]  ;;  %v34_v7 = vld [vmem:[#allocation2 + $0x10] sm:$0xff]  ;;  %vm39_vm1 = vcmask 130048   ;;  %vm113_vm2 = vcmask 261120   ;;  %vm208_vm3 = vcmask 7168  }
  0x14   :  { %232 = vmatprep.mubr.msk.f32.mxu0 %vm289_vm0, %v290_v1  ;;  %243 = vmatprep.mubr.msk.f32.mxu1 %vm289_vm0, %v290_v1  ;;  %v250_v5 = vpack.c.bf16 %v33_v3, %v32_v2  ;;  %v38_v6 = vld [vmem:[#allocation2 + $0x28] sm:$0xff]  ;;  %v35_v8 = vld [vmem:[#allocation2 + $0x18] sm:$0xff]  ;;  %v36_v11 = vld [vmem:[%s347_s1] sm:$0xff] }
  0x15   :  { %v247_v9 = vpack.c.bf16 %v38_v6, %v37_v4  ;;  %v253_v10 = vpack.c.bf16 %v35_v8, %v34_v7  ;;  %v31_v12 = vld [vmem:[%s346_s0] sm:$0xff] }
  0x16   :  { %251 = vmatpush3.bf16.msra.mxu1 %v250_v5  ;;  %v217_v16 = vld [vmem:[%s349_s3] ss:$0 sm:$0xff]  ;;  %v218_v20 = vld [vmem:[%s349_s3 + $0x1] ss:$0 sm:$0xff]  ;;  %v219_v23 = vld [vmem:[%s349_s3 + $0x2] ss:$0 sm:$0xff] }
  0x17   :  { %248 = vmatpush3.bf16.msra.mxu0 %v247_v9  ;;  %252 = vmatprep.subr.bf16.mxu1 %v288_v0 }
  0x1a   :  { %254 = vmatpush3.bf16.msra.mxu1 %v253_v10  ;;  %233 = vmatmul.mubr.msk.f32.vlgmr.msra.gmra.mrb[0].mxu0 %vm39_vm1, %v36_v11 }
  0x1d   :  { %244 = vmatmul.mubr.msk.f32.vlgmr.msra.gmra.mrb[0].mxu1 %vm113_vm2, %v31_v12 }
  0xed   :  { %v109_v13 = vpop.f32.mrb[0].mxu0 }
  0xee   :  { %v234_v14 = vpop.f32.mrb[1].mxu0 }
  0xf0   :  { %v183_v15 = vpop.f32.mrb[0].mxu1 }
  0xf1   :  { %v184_v17 = vadd.f32 %v183_v15, %v109_v13  ;;  %v245_v18 = vpop.f32.mrb[1].mxu1 }
  0xf3   :  { %v192_v19 = vadd.f32 %v217_v16, %v184_v17 }
  0xf5   :  { %v193_v21 = vmax.f32 %v192_v19, 0.0 }
  0xf7   :  { %v199_v22 = vmul.f32 %v218_v20, %v193_v21 }
  0xf9   :  { %200 = vadd.xlane.f32.xlu0 %v199_v22 }
 0x186   :  { %v201_v24 = vpop.xlane.xlu0 %200 }
 0x187   :  { %v207_v25 = vadd.f32 %v219_v23, %v201_v24 }
 0x189   :  { %209 = vst.msk [vmem:[%s350_s4] sm:$0xff] %vm208_vm3, %v207_v25 }
 0x18a   :  { %214 = vsyncpa [#allocation3], 1 }

</bundles_post_ra>
